<compile_context>
chip_gen: v7x
topology: tpu7x:2x2x1
jax: 0.10.0
libtpu: 0.0.40
codegen_flags: <defaults>
</compile_context>

<pallas_src>
import jax
import jax.numpy as jnp
from jax import lax
from jax.experimental import pallas as pl
from jax.experimental.pallas import tpu as pltpu

LANE = 128            # lane width
SUB = 8               # sublanes per f32 vreg (partial-sum tile rows)
ROW_ALIGN = 16        # block-row granularity (bf16-safe min tile is (16,128))
CH_ROWS = 256         # rows folded per inner-loop step
MAX_BLOCK_ROWS = 4096  # 2 inputs x 2 buffers <= 8 MiB -> fits v5e's 16 MiB scoped VMEM


def _round_up(x, m):
    return ((x + m - 1) // m) * m


def _weights_f32(yt):
    # Same thresholds/ordering as the torch list-comp, restructured as two
    # independent selects + one combine to shorten the dependency chain.
    w_lo = jnp.where(yt < 0.25, 1.0, 10.0)
    w_hi = jnp.where(yt < 0.75, 50.0, 100.0)
    return jnp.where(yt < 0.5, w_lo, w_hi)


def _weighted_se_sum_jnp(yt, yp):
    """Plain-jnp sum of w*(yt-yp)^2 (used only for the <128-element tail)."""
    yt = yt.astype(jnp.float32)
    yp = yp.astype(jnp.float32)
    d = yt - yp
    return jnp.sum(_weights_f32(yt) * d * d)


def _make_tiled_kernel(rows, br, ch, needs_mask, scalar_out):
    """Each grid step reduces a (br,128) block to an (8,128) partial sum of
    w*(yt-yp)^2 (or to a (1,1) scalar when scalar_out) via a chunked
    fixed-size accumulator."""
    n_chunks = br // ch

    def kernel(yt_ref, yp_ref, out_ref):
        base = pl.program_id(0) * br
        if needs_mask:
            row_iota = lax.broadcasted_iota(jnp.int32, (ch, LANE), 0)

        def body(c, acc):
            r0 = pl.multiple_of(c * ch, ch)
            yt = yt_ref[pl.ds(r0, ch), :].astype(jnp.float32)   # in-register upcast
            yp = yp_ref[pl.ds(r0, ch), :].astype(jnp.float32)
            d = yt - yp
            se = _weights_f32(yt) * d * d
            if needs_mask:
                # Rows past the logical extent hold garbage from the partial
                # last block's DMA; zero their contribution.
                se = jnp.where(base + r0 + row_iota < rows, se, 0.0)
            # (ch,128)->(ch//8,8,128) is layout-preserving; summing the leading
            # (untiled) axis is pure VPU vreg adds, no XLU.
            return acc + jnp.sum(se.reshape(ch // SUB, SUB, LANE), axis=0)

        acc = lax.fori_loop(0, n_chunks, body,
                            jnp.zeros((SUB, LANE), jnp.float32),
                            unroll=n_chunks <= 8)
        if scalar_out:
            out_ref[...] = jnp.sum(jnp.sum(acc, axis=0, keepdims=True),
                                   axis=1, keepdims=True)
        else:
            out_ref[...] = acc

    return kernel


def _small_kernel(yt_ref, yp_ref, out_ref):
    """rows < 16: one full-array block, reduce straight to a (1,1) scalar."""
    yt = yt_ref[...].astype(jnp.float32)
    yp = yp_ref[...].astype(jnp.float32)
    d = yt - yp
    se = _weights_f32(yt) * d * d
    out_ref[...] = jnp.sum(jnp.sum(se, axis=0, keepdims=True),
                           axis=1, keepdims=True)


def _bulk_sum(yt2d, yp2d, block_rows):
    """Sum of w*(yt-yp)^2 over a (rows,128) pair via the Pallas kernel."""
    rows = yt2d.shape[0]
    in_bytes = rows * LANE * (yt2d.dtype.itemsize + yp2d.dtype.itemsize)

    if rows < ROW_ALIGN:
        # Tiny input: single full-array block, scalar output, no masking needed.
        out = pl.pallas_call(
            _small_kernel,
            out_shape=jax.ShapeDtypeStruct((1, 1), jnp.float32),
            grid=(1,),
            in_specs=[pl.BlockSpec((rows, LANE), lambda i: (0, 0)),
                      pl.BlockSpec((rows, LANE), lambda i: (0, 0))],
            out_specs=pl.BlockSpec((1, 1), lambda i: (0, 0)),
            compiler_params=pltpu.CompilerParams(
                dimension_semantics=("arbitrary",)),
            cost_estimate=pl.CostEstimate(
                flops=10 * rows * LANE, transcendentals=0,
                bytes_accessed=in_bytes + 4),
        )(yt2d, yp2d)
        return out[0, 0]

    # Block sizing: br a multiple of the chunk size, never larger than rows,
    # capped so double-buffered VMEM stays well under every chip's limit.
    br_req = max(ROW_ALIGN, min(int(block_rows), MAX_BLOCK_ROWS))
    br_req = (br_req // ROW_ALIGN) * ROW_ALIGN
    br = min(br_req, (rows // ROW_ALIGN) * ROW_ALIGN)
    ch = min(CH_ROWS, br)
    br = (br // ch) * ch
    num_blocks = pl.cdiv(rows, br)
    if num_blocks == 1 and rows >= 2 * ch:
        # Give v7x's two TensorCores (parallel grid axis) at least two blocks.
        br = max(ch, _round_up(pl.cdiv(rows, 2), ch))
        num_blocks = pl.cdiv(rows, br)
    needs_mask = (rows % br) != 0
    scalar_out = num_blocks == 1

    kernel = _make_tiled_kernel(rows, br, ch, needs_mask, scalar_out)

    if scalar_out:
        out_shape = jax.ShapeDtypeStruct((1, 1), jnp.float32)
        out_spec = pl.BlockSpec((1, 1), lambda i: (0, 0))
        out_bytes = 4
    else:
        out_shape = jax.ShapeDtypeStruct((num_blocks * SUB, LANE), jnp.float32)
        out_spec = pl.BlockSpec((SUB, LANE), lambda i: (i, 0))
        out_bytes = num_blocks * SUB * LANE * 4

    out = pl.pallas_call(
        kernel,
        out_shape=out_shape,
        grid=(num_blocks,),
        in_specs=[pl.BlockSpec((br, LANE), lambda i: (i, 0)),
                  pl.BlockSpec((br, LANE), lambda i: (i, 0))],
        out_specs=out_spec,
        compiler_params=pltpu.CompilerParams(
            dimension_semantics=("parallel",)),
        cost_estimate=pl.CostEstimate(
            flops=10 * rows * LANE, transcendentals=0,
            bytes_accessed=in_bytes + out_bytes),
    )(yt2d, yp2d)

    return out[0, 0] if scalar_out else jnp.sum(out)


def custom_loss(y_true, y_pred, *, block_rows=2048):
    """Weighted MSE matching CustomLoss.forward.  Inputs: 1-D arrays (N,)."""
    assert y_true.shape == y_pred.shape and y_true.ndim == 1
    n = y_true.shape[0]
    if n == 0:
        return jnp.float32(jnp.nan)   # torch.mean of an empty tensor is NaN

    n_main = (n // LANE) * LANE

    # Ragged tail (< 128 elements): plain jnp, negligible work.
    tail_sum = None
    if n_main < n:
        tail_sum = _weighted_se_sum_jnp(y_true[n_main:], y_pred[n_main:])

    if n_main == 0:
        return tail_sum / n

    # Aligned prefix through the kernel.  When N is 128-aligned the reshape is
    # metadata-only (zero extra HBM traffic); for ragged N the prefix slice is
    # a single copy — still far cheaper than the old pad + astype copies.
    yt = y_true if n_main == n else y_true[:n_main]
    yp = y_pred if n_main == n else y_pred[:n_main]
    main_sum = _bulk_sum(yt.reshape(n_main // LANE, LANE),
                         yp.reshape(n_main // LANE, LANE), block_rows)

    total = main_sum if tail_sum is None else main_sum + tail_sum
    return total / n


def _reference(y_true, y_pred):
    yt = y_true.astype(jnp.float32)
    yp = y_pred.astype(jnp.float32)
    w = jnp.where(yt < 0.25, 1.0,
                  jnp.where(yt < 0.5, 10.0,
                            jnp.where(yt < 0.75, 50.0, 100.0)))
    return jnp.mean(w * (yt - yp) ** 2)


if __name__ == "__main__":
    key = jax.random.PRNGKey(0)

    def check(n, dtype=jnp.float32, **kw):
        k1, k2 = jax.random.split(jax.random.fold_in(key, n))
        yt = jax.random.uniform(k1, (n,), dtype=jnp.float32).astype(dtype)
        yp = jax.random.uniform(k2, (n,), dtype=jnp.float32).astype(dtype)
        loss = custom_loss(yt, yp, **kw)
        jax.block_until_ready(loss)
        ref = _reference(yt, yp)
        assert jnp.allclose(loss, ref, rtol=2e-5, atol=1e-6), (n, kw, loss, ref)

    # Ragged small N: single-block scalar fast path + jnp tail (rows = 7).
    check(1000)
    # Aligned N, small blocks: 4-way parallel grid, (8,128) partials, no mask.
    check(8192, block_rows=16)
    # Aligned N, default blocks: auto-split into >=2 blocks for megacore.
    check(65536)
    # Ragged multi-block with in-kernel row masking + jnp tail.
    check(70000, block_rows=256)
    # bf16 inputs read natively, upcast in-register.
    check(4096, dtype=jnp.bfloat16)

    # Also verify it traces/compiles under jit (zero-copy reshape path).
    jitted = jax.jit(custom_loss)
    k1, k2 = jax.random.split(jax.random.fold_in(key, 12345))
    yt = jax.random.uniform(k1, (16384,), dtype=jnp.float32)
    yp = jax.random.uniform(k2, (16384,), dtype=jnp.float32)
    l = jitted(yt, yp)
    jax.block_until_ready(l)
    assert jnp.allclose(l, _reference(yt, yp), rtol=2e-5, atol=1e-6)

    print("KERNEL_OK")
</pallas_src>

<mosaic_0001>
module attributes {stable_mosaic.version = 11 : i64} {
  func.func @_small_kernel(%arg0: i32, %arg1: memref<7x128xf32, #tpu.memory_space<vmem>>, %arg2: memref<7x128xf32, #tpu.memory_space<vmem>>, %arg3: memref<1x1xf32, #tpu.memory_space<vmem>>) attributes {dimension_semantics = [#tpu.dimension_semantics<arbitrary>], iteration_bounds = array<i64: 1>, scalar_prefetch = 0 : i64, scratch_operands = 0 : i64, tpu.core_type = #tpu.core_type<tc>, window_params = [{pipeline_mode = #tpu.pipeline_mode<synchronous>, transform_indices = @transform_0, window_bounds = array<i64: 7, 128>}, {pipeline_mode = #tpu.pipeline_mode<synchronous>, transform_indices = @transform_1, window_bounds = array<i64: 7, 128>}, {pipeline_mode = #tpu.pipeline_mode<synchronous>, transform_indices = @transform_2, window_bounds = array<i64: 1, 1>}]} {
    %c0 = arith.constant 0 : index
    %c0_0 = arith.constant 0 : index
    %0 = vector.load %arg1[%c0, %c0_0] : memref<7x128xf32, #tpu.memory_space<vmem>>, vector<7x128xf32>
    %c0_1 = arith.constant 0 : index
    %c0_2 = arith.constant 0 : index
    %1 = vector.load %arg2[%c0_1, %c0_2] : memref<7x128xf32, #tpu.memory_space<vmem>>, vector<7x128xf32>
    %2 = arith.subf %0, %1 : vector<7x128xf32>
    %cst = arith.constant 2.500000e-01 : f32
    %3 = vector.broadcast %cst : f32 to vector<7x128xf32>
    %4 = arith.cmpf olt, %0, %3 : vector<7x128xf32>
    %cst_3 = arith.constant 1.000000e+00 : f32
    %cst_4 = arith.constant 1.000000e+01 : f32
    %5 = vector.broadcast %cst_3 : f32 to vector<7x128xf32>
    %6 = vector.broadcast %cst_4 : f32 to vector<7x128xf32>
    %7 = arith.select %4, %5, %6 : vector<7x128xi1>, vector<7x128xf32>
    %cst_5 = arith.constant 7.500000e-01 : f32
    %8 = vector.broadcast %cst_5 : f32 to vector<7x128xf32>
    %9 = arith.cmpf olt, %0, %8 : vector<7x128xf32>
    %cst_6 = arith.constant 5.000000e+01 : f32
    %cst_7 = arith.constant 1.000000e+02 : f32
    %10 = vector.broadcast %cst_6 : f32 to vector<7x128xf32>
    %11 = vector.broadcast %cst_7 : f32 to vector<7x128xf32>
    %12 = arith.select %9, %10, %11 : vector<7x128xi1>, vector<7x128xf32>
    %cst_8 = arith.constant 5.000000e-01 : f32
    %13 = vector.broadcast %cst_8 : f32 to vector<7x128xf32>
    %14 = arith.cmpf olt, %0, %13 : vector<7x128xf32>
    %15 = arith.select %14, %7, %12 : vector<7x128xi1>, vector<7x128xf32>
    %16 = arith.mulf %15, %2 : vector<7x128xf32>
    %17 = arith.mulf %16, %2 : vector<7x128xf32>
    %cst_9 = arith.constant dense<0.000000e+00> : vector<128xf32>
    %18 = vector.multi_reduction <add>, %17, %cst_9 [0] : vector<7x128xf32> to vector<128xf32>
    %19 = vector.shape_cast %18 : vector<128xf32> to vector<1x128xf32>
    %cst_10 = arith.constant dense<0.000000e+00> : vector<1xf32>
    %20 = vector.multi_reduction <add>, %19, %cst_10 [1] : vector<1x128xf32> to vector<1xf32>
    %21 = vector.shape_cast %20 : vector<1xf32> to vector<1x1xf32>
    %c0_11 = arith.constant 0 : index
    %c0_12 = arith.constant 0 : index
    %22 = vector.load %arg3[%c0_11, %c0_12] : memref<1x1xf32, #tpu.memory_space<vmem>>, vector<1x1xf32>
    tpu.vector_store %arg3[%c0_11, %c0_12], %21 {strides = array<i32>} : memref<1x1xf32, #tpu.memory_space<vmem>>, vector<1x1xf32>,
    return
  }
  func.func @transform_0(%arg0: i32) -> (i32, i32) {
    %c0_i32 = arith.constant 0 : i32
    %c0_i32_0 = arith.constant 0 : i32
    %c0_i32_1 = arith.constant 0 : i32
    return %c0_i32, %c0_i32_0 : i32, i32
  }
  func.func @transform_1(%arg0: i32) -> (i32, i32) {
    %c0_i32 = arith.constant 0 : i32
    %c0_i32_0 = arith.constant 0 : i32
    %c0_i32_1 = arith.constant 0 : i32
    return %c0_i32, %c0_i32_0 : i32, i32
  }
  func.func @transform_2(%arg0: i32) -> (i32, i32) {
    %c0_i32 = arith.constant 0 : i32
    %c0_i32_0 = arith.constant 0 : i32
    %c0_i32_1 = arith.constant 0 : i32
    return %c0_i32, %c0_i32_0 : i32, i32
  }
}

</mosaic_0001>

<bundles_post_ra>
// kernel: tpu_custom_call.1
= control target key start
LH: loop header
LB: loop body
LE: loop exit
PB: predicated region body
PF: predicated region fallthrough
CT: control target
= control target key end

     0   :  { %7 = vsyncpa [#allocation3], 0  ;;  %s208_s0 = inlined_call_operand.hbm [shape: f32[7,128], index: 0, kind: input, shape index: {}]   ;;  %s209_s1 = inlined_call_operand.hbm [shape: f32[7,128], index: 1, kind: input, shape index: {}]   ;;  %s210_s2 = inlined_call_operand.hbm [shape: f32[1,1], index: 2, kind: output, shape index: {}]  }
   0x1   :  { %8 = vsyncpa [#allocation6], 0 }
   0x2   :  { %9 = vsyncpa [#allocation4], 0  ;;  %s152_s9 = smov [#allocation2]   ;;  %s153_s11 = smov [#allocation5]  }
   0x3   :  { %s16_s10 = sshll.u32 %s152_s9, 4  ;;  %s26_s12 = sshll.u32 %s153_s11, 4  ;;  %s17_s10 = int_to_ptr.vmem [resolvable:$true] %s16_s10  ;;  %s27_s12 = int_to_ptr.vmem [resolvable:$true] %s26_s12 }
   0x4   :  { %s80_s15 = scalar_lea.hbm %s208_s0, 128 }
   0x5   :  { %p81_p0 = scmp.ne.s32.totalorder %s208_s0, %s80_s15  ;;  %p84_p1 = scmp.lt.u32.totalorder %s80_s15, %s208_s0 }
   0x7   :  { %p86_p2 = pnand %p84_p1, %p81_p0 }
   0x9   :  { %89 = shalt.err (!%p86_p2)
}
   0xa   :  { %s90_s20 = scalar_lea.vmem %s17_s10, 128  ;;  %p95_p4 = scmp.lt.s32.totalorder %s17_s10, %s17_s10 }
   0xb   :  { %p91_p3 = scmp.ne.s32.totalorder %s17_s10, %s90_s20  ;;  %p96_p5 = scmp.lt.s32.totalorder %s90_s20, %s90_s20 }
   0xd   :  { %p97_p6 = por %p96_p5, %p95_p4 }
   0xf   :  { %p98_p7 = pnand %p97_p6, %p91_p3 }
  0x11   :  { %101 = shalt.err (!%p98_p7)
}
  0x12   :  { %19 = dma.hbm_to_vmem [thread:$0]  %s208_s0, 128, %s17_s10, [#allocation3]  }
  0x13   :  { %s102_s25 = scalar_lea.hbm %s209_s1, 128 }
  0x14   :  { %p103_p8 = scmp.ne.s32.totalorder %s209_s1, %s102_s25  ;;  %p106_p9 = scmp.lt.u32.totalorder %s102_s25, %s209_s1 }
  0x16   :  { %p108_p10 = pnand %p106_p9, %p103_p8 }
  0x18   :  { %111 = shalt.err (!%p108_p10)
}
  0x19   :  { %s112_s30 = scalar_lea.vmem %s27_s12, 128  ;;  %p117_p12 = scmp.lt.s32.totalorder %s27_s12, %s27_s12 }
  0x1a   :  { %p113_p11 = scmp.ne.s32.totalorder %s27_s12, %s112_s30  ;;  %p118_p13 = scmp.lt.s32.totalorder %s112_s30, %s112_s30 }
  0x1c   :  { %p119_p0 = por %p118_p13, %p117_p12 }
  0x1e   :  { %p120_p1 = pnand %p119_p0, %p113_p11 }
  0x20   :  { %123 = shalt.err (!%p120_p1)
}
  0x21   :  { %29 = dma.hbm_to_vmem [thread:$0]  %s209_s1, 128, %s27_s12, [#allocation6]  }
  0x22   :  { %146 = dma.done.wait [#allocation3], 128  }
  0x23   :  { %147 = vsyncadd [#allocation3], 4294967168 }
  0x24   :  { %148 = dma.done.wait [#allocation6], 128  }
  0x25   :  { %149 = vsyncadd [#allocation6], 4294967168  ;;  %v36_v0 = vld [vmem:[#allocation2] sm:$0x7f]  ;;  %v37_v1 = vld [vmem:[#allocation5] sm:$0x7f] }
  0x26   :  { %v38_v2 = vsub.f32 %v36_v0, %v37_v1  ;;  %vm39_vm0 = vcmp.lt.f32.partialorder %v36_v0, 0.25  ;;  %vm41_vm1 = vcmp.lt.f32.partialorder %v36_v0, 0.75  ;;  %vm43_vm2 = vcmp.lt.f32.partialorder %v36_v0, 0.5  ;;  %s156_s1 = smov [#allocation7]  }
  0x27   :  { %v154_v3 = vmov 10.0   ;;  %v155_v5 = vmov 100.0   ;;  %vm47_vm3 = vcmask 1046528   ;;  %s65_s4 = sshll.u32 %s156_s1, 4  ;;  %vm57_vm4 = vcmask 0   ;;  %s66_s4 = int_to_ptr.vmem [resolvable:$true] %s65_s4 }
  0x28   :  { %v40_v4 = vsel %vm39_vm0, 1.0, %v154_v3  ;;  %v42_v6 = vsel %vm41_vm1, 50.0, %v155_v5  ;;  %s124_s5 = scalar_lea.vmem %s66_s4, 16  ;;  %s128_s6 = scalar_lea.vmem %s66_s4, 32 }
  0x29   :  { %v44_v7 = vsel %vm43_vm2, %v40_v4, %v42_v6  ;;  %p125_p2 = scmp.ne.s32.totalorder %s66_s4, %s124_s5  ;;  %p129_p3 = scmp.lt.s32.totalorder %s66_s4, %s66_s4 }
  0x2a   :  { %v45_v8 = vmul.f32 %v44_v7, %v38_v2  ;;  %p130_p4 = scmp.lt.s32.totalorder %s128_s6, %s124_s5 }
  0x2c   :  { %v46_v9 = vmul.f32 %v45_v8, %v38_v2  ;;  %p131_p5 = por %p130_p4, %p129_p3 }
  0x2e   :  { %v48_v10 = vsel %vm47_vm3, %v46_v9, 0.0  ;;  %p132_p6 = pnand %p131_p5, %p125_p2 }
  0x2f   :  { %v49_v11 = vrot.slane %v48_v10, 4 }
  0x31   :  { %v50_v12 = vadd.f32 %v49_v11, %v48_v10 }
  0x33   :  { %v51_v13 = vrot.slane %v50_v12, 2 }
  0x35   :  { %v52_v14 = vadd.f32 %v51_v13, %v50_v12 }
  0x37   :  { %v53_v15 = vrot.slane %v52_v14, 1 }
  0x39   :  { %v54_v16 = vadd.f32 %v53_v15, %v52_v14 }
  0x3b   :  { %55 = vadd.xlane.f32.xlu0 %v54_v16 }
  0xc8   :  { %v56_v17 = vpop.xlane.xlu0 %55 }
  0xc9   :  { %58 = vst.msk [vmem:[#allocation7] sm:$0x1] %vm57_vm4, %v56_v17 }
  0xca   :  { %135 = shalt.err (!%p132_p6)
}
  0xcb   :  { %s136_s9 = scalar_lea.hbm %s210_s2, 16 }
  0xcc   :  { %p137_p7 = scmp.ne.s32.totalorder %s210_s2, %s136_s9  ;;  %p140_p8 = scmp.lt.u32.totalorder %s136_s9, %s210_s2 }
  0xce   :  { %p142_p9 = pnand %p140_p8, %p137_p7 }
  0xd0   :  { %145 = shalt.err (!%p142_p9)
}
  0xd1   :  { %68 = dma.vmem_to_hbm [thread:$0]  %s66_s4, 16, %s210_s2, [#allocation4]  }
  0xd2   :  { %150 = dma.done.wait [#allocation4], 16  }
  0xd3   :  { %151 = vsyncadd [#allocation4], 4294967280 }
  0xd4   :  { %72 = vsyncpa [#allocation3], 1 }
  0xd5   :  { %73 = vsyncpa [#allocation6], 1 }
  0xd6   :  { %74 = vsyncpa [#allocation4], 1 }

</bundles_post_ra>
